<compile_context>
chip_gen: v6e
topology: v6e:2x2x1
jax: 0.10.0
libtpu: 0.0.40
codegen_flags: <defaults>
</compile_context>

<pallas_src>
import functools

import jax
import jax.numpy as jnp
from jax.experimental import pallas as pl
from jax.experimental.pallas import tpu as pltpu


def _ce_partial_sum_kernel(logits_ref, target_ref, psum_ref, *, total_n, tile_n):
    i = pl.program_id(0)

    logits = logits_ref[...]                               # (tile_n, C), input dtype
    tgt = target_ref[...]                                  # (tile_n, 1), int32
    tn, c = logits.shape

    # Row max + shift in the input dtype (max is exact in bf16; subtract is VALU-native).
    row_max = jnp.max(logits, axis=-1, keepdims=True)      # (tile_n, 1)
    shifted = logits - row_max                             # (tile_n, C)

    # f32 only on the exp/accumulate path — no up-front f32 tile materialization.
    sumexp = jnp.sum(jnp.exp(shifted.astype(jnp.float32)), axis=-1, keepdims=True)
    lse = jnp.log(sumexp)                                  # (tile_n, 1) f32

    # Target logit via one-hot select: (1, C) lane iota broadcast against (tile_n, 1) tgt.
    # One-hot sum is exact in the input dtype (only one non-zero per row).
    col_ids = jax.lax.broadcasted_iota(jnp.int32, (1, c), 1)
    picked = jnp.sum(jnp.where(col_ids == tgt, logits, 0),
                     axis=-1, keepdims=True).astype(jnp.float32)   # (tile_n, 1)

    nll = (lse + row_max.astype(jnp.float32)) - picked     # per-row -log p[target]

    # Mask rows past N (partial last tile) BEFORE reducing so OOB garbage can't leak in.
    row_ids = i * tile_n + jax.lax.broadcasted_iota(jnp.int32, (tn, 1), 0)
    nll = jnp.where(row_ids < total_n, nll, 0.0)

    # One scalar per grid step (lane-dense (1,1) block; final reduce over tiles in XLA).
    psum_ref[...] = jnp.sum(nll, keepdims=True)


_MAX_TILE_ROWS = 2048


def _sublane_multiple(dtype):
    # Native sublane packing: 8 rows for 4-byte, 16 for 2-byte, 32 for 1-byte dtypes.
    return max(8, 32 // jnp.dtype(dtype).itemsize)


def _budgets():
    """(vmem_limit_bytes, logits_tile_bytes) derived from this generation's VMEM size."""
    try:
        cap = int(pltpu.get_tpu_info().vmem_capacity_bytes)
    except Exception:
        cap = 64 * 1024 * 1024                       # conservative fallback (v7x-sized)
    if cap >= 128 * 1024 * 1024:                     # v5e / v6e: 128 MiB physical VMEM
        return 100 * 1024 * 1024, 16 * 1024 * 1024
    return 48 * 1024 * 1024, 8 * 1024 * 1024         # v7x: 64 MiB physical VMEM


def _pick_tile_n(n, c, dtype, tile_bytes):
    sub = _sublane_multiple(dtype)
    itemsize = jnp.dtype(dtype).itemsize
    rows = max(sub, tile_bytes // (c * itemsize))    # budget counts DMA'd input bytes
    rows = min(rows, _MAX_TILE_ROWS)
    if n > sub:
        # Keep >= 2 grid steps so the "parallel" batch axis can shard across v7x's 2 TCs.
        half_rows = (((n + 1) // 2) + sub - 1) // sub * sub
        rows = min(rows, half_rows)
    if rows >= n:
        return n                                     # single tile: block dim == array dim
    return max(sub, (rows // sub) * sub)


def cross_entropy_loss(logits, target):
    """Mean cross-entropy. logits: [N, C] float32/bfloat16 (bf16 preferred — the kernel
    is HBM-bound and upcasts internally), target: [N] int class ids -> scalar float32."""
    n, c = logits.shape
    vmem_limit, tile_bytes = _budgets()
    tile_n = _pick_tile_n(n, c, logits.dtype, tile_bytes)
    num_tiles = pl.cdiv(n, tile_n)
    target2d = target.reshape(n, 1).astype(jnp.int32)

    kernel = functools.partial(_ce_partial_sum_kernel, total_n=n, tile_n=tile_n)

    psums = pl.pallas_call(
        kernel,
        out_shape=jax.ShapeDtypeStruct((num_tiles, 1), jnp.float32),
        grid=(num_tiles,),
        in_specs=[
            pl.BlockSpec((tile_n, c), lambda i: (i, 0)),
            pl.BlockSpec((tile_n, 1), lambda i: (i, 0)),
        ],
        out_specs=pl.BlockSpec((1, 1), lambda i: (i, 0)),
        compiler_params=pltpu.CompilerParams(
            dimension_semantics=("parallel",),
            vmem_limit_bytes=vmem_limit,
        ),
        cost_estimate=pl.CostEstimate(
            flops=5 * n * c,
            transcendentals=n * c,
            bytes_accessed=n * c * logits.dtype.itemsize + n * 4 + num_tiles * 4,
        ),
    )(logits, target2d)

    # Tiny (num_tiles,) reduction + mean in XLA; keeps the batch grid axis "parallel".
    return jnp.sum(psums) / jnp.float32(n)


if __name__ == "__main__":
    # crossentropy_loss() with weight=None has no parameters to initialize.
    key = jax.random.PRNGKey(0)
    k1, k2, k3, k4 = jax.random.split(key, 4)

    # Small demo shape (2-D minibatch-of-class-scores case of nn.CrossEntropyLoss).
    N, C = 8, 32
    logits = jax.random.normal(k1, (N, C), dtype=jnp.float32)
    target = jax.random.randint(k2, (N,), 0, C, dtype=jnp.int32)
    loss = jax.block_until_ready(cross_entropy_loss(logits, target))

    logp_ref = jax.nn.log_softmax(logits, axis=-1)
    ref = -jnp.mean(logp_ref[jnp.arange(N), target])
    assert jnp.allclose(loss, ref, atol=1e-5, rtol=1e-5), (loss, ref)

    # Multi-tile, non-divisible-N, bf16 path (exercises pipelined grid + row masking
    # + per-tile partial sums + the bf16 sublane-multiple tile rounding).
    N2, C2 = 1040, 256
    logits2 = jax.random.normal(k3, (N2, C2), dtype=jnp.float32).astype(jnp.bfloat16)
    target2 = jax.random.randint(k4, (N2,), 0, C2, dtype=jnp.int32)
    loss2 = jax.block_until_ready(cross_entropy_loss(logits2, target2))

    logp2_ref = jax.nn.log_softmax(logits2.astype(jnp.float32), axis=-1)
    ref2 = -jnp.mean(logp2_ref[jnp.arange(N2), target2])
    assert jnp.allclose(loss2, ref2, atol=2e-3, rtol=2e-3), (loss2, ref2)

    print("KERNEL_OK")
</pallas_src>

<mosaic_0001>
module attributes {stable_mosaic.version = 11 : i64} {
  func.func @_ce_partial_sum_kernel(%arg0: i32, %arg1: memref<8x32xf32, #tpu.memory_space<vmem>>, %arg2: memref<8x1xi32, #tpu.memory_space<vmem>>, %arg3: memref<1x1xf32, #tpu.memory_space<vmem>>) attributes {dimension_semantics = [#tpu.dimension_semantics<parallel>], iteration_bounds = array<i64: 1>, scalar_prefetch = 0 : i64, scratch_operands = 0 : i64, tpu.core_type = #tpu.core_type<tc>, window_params = [{transform_indices = @transform_0, window_bounds = array<i64: 8, 32>}, {transform_indices = @transform_1, window_bounds = array<i64: 8, 1>}, {transform_indices = @transform_2, window_bounds = array<i64: 1, 1>}]} {
    %c0 = arith.constant 0 : index
    %c0_0 = arith.constant 0 : index
    %0 = vector.load %arg1[%c0, %c0_0] : memref<8x32xf32, #tpu.memory_space<vmem>>, vector<8x32xf32>
    %c0_1 = arith.constant 0 : index
    %c0_2 = arith.constant 0 : index
    %1 = vector.load %arg2[%c0_1, %c0_2] : memref<8x1xi32, #tpu.memory_space<vmem>>, vector<8x1xi32>
    %cst = arith.constant dense<0xFF800000> : vector<8xf32>
    %2 = vector.multi_reduction <maximumf>, %0, %cst [1] : vector<8x32xf32> to vector<8xf32>
    %3 = vector.shape_cast %2 : vector<8xf32> to vector<8x1xf32>
    %4 = vector.broadcast %3 : vector<8x1xf32> to vector<8x32xf32>
    %5 = arith.subf %0, %4 : vector<8x32xf32>
    %6 = math.exp %5 : vector<8x32xf32>
    %cst_3 = arith.constant dense<0.000000e+00> : vector<8xf32>
    %7 = vector.multi_reduction <add>, %6, %cst_3 [1] : vector<8x32xf32> to vector<8xf32>
    %8 = vector.shape_cast %7 : vector<8xf32> to vector<8x1xf32>
    %9 = math.log %8 : vector<8x1xf32>
    %10 = tpu.iota {dimensions = array<i32: 1>} : vector<1x32xi32>
    %11 = vector.broadcast %10 : vector<1x32xi32> to vector<8x32xi32>
    %12 = vector.broadcast %1 : vector<8x1xi32> to vector<8x32xi32>
    %13 = arith.cmpi eq, %11, %12 : vector<8x32xi32>
    %c0_i32 = arith.constant 0 : i32
    %14 = arith.sitofp %c0_i32 : i32 to f32
    %15 = vector.broadcast %14 : f32 to vector<8x32xf32>
    %16 = arith.select %13, %0, %15 : vector<8x32xi1>, vector<8x32xf32>
    %cst_4 = arith.constant dense<0.000000e+00> : vector<8xf32>
    %17 = vector.multi_reduction <add>, %16, %cst_4 [1] : vector<8x32xf32> to vector<8xf32>
    %18 = vector.shape_cast %17 : vector<8xf32> to vector<8x1xf32>
    %19 = arith.addf %9, %3 : vector<8x1xf32>
    %20 = arith.subf %19, %18 : vector<8x1xf32>
    %c8_i32 = arith.constant 8 : i32
    %21 = arith.muli %arg0, %c8_i32 : i32
    %22 = tpu.iota {dimensions = array<i32: 0>} : vector<8x1xi32>
    %23 = vector.broadcast %21 : i32 to vector<8x1xi32>
    %24 = arith.addi %23, %22 : vector<8x1xi32>
    %c8_i32_5 = arith.constant 8 : i32
    %25 = vector.broadcast %c8_i32_5 : i32 to vector<8x1xi32>
    %26 = arith.cmpi slt, %24, %25 : vector<8x1xi32>
    %cst_6 = arith.constant 0.000000e+00 : f32
    %27 = vector.broadcast %cst_6 : f32 to vector<8x1xf32>
    %28 = arith.select %26, %20, %27 : vector<8x1xi1>, vector<8x1xf32>
    %29 = vector.shape_cast %28 : vector<8x1xf32> to vector<1x8x1xf32>
    %cst_7 = arith.constant dense<0.000000e+00> : vector<1xf32>
    %30 = vector.multi_reduction <add>, %29, %cst_7 [1, 2] : vector<1x8x1xf32> to vector<1xf32>
    %31 = vector.shape_cast %30 : vector<1xf32> to vector<1x1x1xf32>
    %32 = vector.extract %31[0, 0, 0] : f32 from vector<1x1x1xf32>
    %33 = vector.broadcast %32 : f32 to vector<1x1xf32>
    %c0_8 = arith.constant 0 : index
    %c0_9 = arith.constant 0 : index
    %34 = vector.load %arg3[%c0_8, %c0_9] : memref<1x1xf32, #tpu.memory_space<vmem>>, vector<1x1xf32>
    tpu.vector_store %arg3[%c0_8, %c0_9], %33 {strides = array<i32>} : memref<1x1xf32, #tpu.memory_space<vmem>>, vector<1x1xf32>,
    return
  }
  func.func @transform_0(%arg0: i32) -> (i32, i32) {
    %c0_i32 = arith.constant 0 : i32
    %c0_i32_0 = arith.constant 0 : i32
    return %arg0, %c0_i32 : i32, i32
  }
  func.func @transform_1(%arg0: i32) -> (i32, i32) {
    %c0_i32 = arith.constant 0 : i32
    %c0_i32_0 = arith.constant 0 : i32
    return %arg0, %c0_i32 : i32, i32
  }
  func.func @transform_2(%arg0: i32) -> (i32, i32) {
    %c0_i32 = arith.constant 0 : i32
    %c0_i32_0 = arith.constant 0 : i32
    return %arg0, %c0_i32 : i32, i32
  }
}

</mosaic_0001>

<bundles_post_ra>
// kernel: tpu_custom_call.1
= control target key start
LH: loop header
LB: loop body
LE: loop exit
PB: predicated region body
PF: predicated region fallthrough
CT: control target
= control target key end

     0   :  { %vm14_vm0 = vcmask 261120   ;;  %s133_s0 = inlined_call_operand.vmem [shape: f32[8,32], index: 0, kind: input, shape index: {}]   ;;  %s134_s1 = inlined_call_operand.vmem [shape: s32[8,1], index: 1, kind: input, shape index: {}]   ;;  %s135_s2 = inlined_call_operand.hbm [shape: f32[1,1], index: 2, kind: output, shape index: {}]  }
   0x1   :  { %v12_v0 = vld [vmem:[%s133_s0] sm:$0xff] }
   0x2   :  { %7 = vsyncpa [#allocation3], 0  ;;  %v15_v1 = vsel %vm14_vm0, %v12_v0, -inf  ;;  %v104_v2 = vmov 0   ;;  %v13_v3 = vld [vmem:[%s134_s1] sm:$0xff]  ;;  %v26_v7 = vlaneseq  ;;  %vm45_vm2 = vcmask 7168  }
   0x3   :  { %77 = vset.pattern.permute.xlu0 %v104_v2  ;;  %s105_s0 = smov [#allocation2]   ;;  %vm57_vm3 = vcmask 0  }
   0x4   :  { %16 = vmax.xlane.f32.xlu0 %v15_v1  ;;  %v27_v8 = vand.u32 127, %v26_v7  ;;  %s65_s1 = sshll.u32 %s105_s0, 4  ;;  %s66_s1 = int_to_ptr.vmem [resolvable:$true] %s65_s1 }
   0x5   :  { %s82_s14 = scalar_lea.vmem %s66_s1, 16  ;;  %s86_s15 = scalar_lea.vmem %s66_s1, 32 }
   0x6   :  { %p83_p0 = scmp.ne.s32.totalorder %s66_s1, %s82_s14  ;;  %p87_p1 = scmp.lt.s32.totalorder %s66_s1, %s66_s1 }
   0x7   :  { %p88_p2 = scmp.lt.s32.totalorder %s86_s15, %s82_s14 }
   0x9   :  { %p89_p3 = por %p88_p2, %p87_p1 }
   0xb   :  { %p90_p4 = pnand %p89_p3, %p83_p0 }
  0x1a   :  { %29 = vperm.xlu0 %77, %v13_v3  }
  0x8d   :  { %v17_v4 = vpop.xlane.xlu0 %16 }
  0x8e   :  { %v18_v5 = vsub.f32 %v12_v0, %v17_v4 }
  0x90   :  { %v19_v6 = vmul.f32 1.442695, %v18_v5 }
  0x92   :  { %78 = vpow2.f32 %v19_v6 }
  0x95   :  { %v30_v9 = vpop.permute.xlu0 %29 }
  0x96   :  { %vm31_vm1 = vcmp.eq.s32.totalorder %v27_v8, %v30_v9 }
  0x97   :  { %v32_v11 = vsel %vm31_vm1, %v12_v0, 0.0 }
  0x98   :  { %v33_v13 = vsel %vm14_vm0, %v32_v11, 0.0 }
  0x9f   :  { %v79_v10 = vpop.eup %78 }
  0xa0   :  { %v21_v12 = vsel %vm14_vm0, %v79_v10, 0.0 }
  0xa1   :  { %22 = vadd.xlane.f32.xlu1 %v21_v12 }
  0xa5   :  { %34 = vadd.xlane.f32.xlu1 %v33_v13 }
 0x12a   :  { %v23_v14 = vpop.xlane.xlu1 %22 }
 0x12b   :  { %80 = vlog2.f32 %v23_v14 }
 0x12e   :  { %v35_v17 = vpop.xlane.xlu1 %34 }
 0x138   :  { %v81_v15 = vpop.eup %80 }
 0x139   :  { %v25_v16 = vmul.f32 0.6931472, %v81_v15 }
 0x13b   :  { %v36_v18 = vadd.f32 %v25_v16, %v17_v4 }
 0x13d   :  { %v37_v19 = vsub.f32 %v36_v18, %v35_v17 }
 0x13f   :  { %v46_v20 = vsel %vm45_vm2, %v37_v19, 0.0 }
 0x140   :  { %47 = vadd.xlane.f32.xlu1 %v46_v20 }
 0x1c9   :  { %v48_v21 = vpop.xlane.xlu1 %47 }
 0x1ca   :  { %v49_v22 = vrot.slane %v48_v21, 4 }
 0x1cc   :  { %v50_v23 = vadd.f32 %v49_v22, %v48_v21 }
 0x1ce   :  { %v51_v24 = vrot.slane %v50_v23, 2 }
 0x1d0   :  { %v52_v25 = vadd.f32 %v51_v24, %v50_v23 }
 0x1d2   :  { %v53_v26 = vrot.slane %v52_v25, 1 }
 0x1d4   :  { %v54_v27 = vadd.f32 %v53_v26, %v52_v25 }
 0x1d6   :  { %73 = vpush %v54_v27 }
 0x207   :  { %s74_s13 = spop %73 }
 0x208   :  { %v56_v28 = vstv %s74_s13 }
 0x209   :  { %58 = vst.msk [vmem:[#allocation2] sm:$0x1] %vm57_vm3, %v56_v28 }
 0x20a   :  { %93 = shalt.err (!%p90_p4)
}
 0x20b   :  { %68 = dma.vmem_to_hbm [thread:$0]  %s66_s1, 16, %s135_s2, [#allocation3]  }
 0x20c   :  { %102 = dma.done.wait [#allocation3], 16  }
 0x20d   :  { %103 = vsyncadd [#allocation3], 4294967280 }
 0x20e   :  { %72 = vsyncpa [#allocation3], 1 }

</bundles_post_ra>
